<compile_context>
chip_gen: v5e
topology: v5e:2x2
jax: 0.10.0
libtpu: 0.0.40
codegen_flags: <defaults>
</compile_context>

<pallas_src>
import functools

import jax
import jax.numpy as jnp
from jax.experimental import pallas as pl
from jax.experimental.pallas import tpu as pltpu

n_embd = 32
vocab_size = 65          # synthetic stand-in for len(sorted(set(text)))
VOCAB_PAD = 128          # lane-dense padded vocab (multiple of 128)
NEG_BIG = -1e30          # finite "minus infinity" for padded logit columns


def _round_up(x, m):
    return (x + m - 1) // m * m


def _tiling(n):
    tile_n = min(_round_up(max(n, 8), 8), 512)
    n_pad = _round_up(n, tile_n)
    return tile_n, n_pad


def _pad_rows(x, n_pad):
    n = x.shape[0]
    if n_pad == n:
        return x
    return jnp.pad(x, ((0, n_pad - n), (0, 0)))


# ---------------------------------------------------------------------------
# Kernels
# ---------------------------------------------------------------------------

def _bigram_loss_kernel(n_valid, idx_ref, tgt_ref, table_ref,
                        logits_ref, loss_ref, loss_acc):
    """One row tile: logits = onehot(idx) @ fused table; accumulate CE loss."""
    i = pl.program_id(0)
    tile_n = idx_ref.shape[0]
    v_pad = table_ref.shape[1]

    @pl.when(i == 0)
    def _():
        loss_acc[0] = jnp.float32(0.0)

    # one-hot(token ids) @ precomputed (emb @ W^T + b) table: single MXU pass
    iota_v = jax.lax.broadcasted_iota(jnp.int32, (tile_n, v_pad), 1)
    onehot_idx = (iota_v == idx_ref[...]).astype(jnp.float32)            # (tn, 128)
    logits = jnp.dot(onehot_idx, table_ref[...],
                     preferred_element_type=jnp.float32)                 # (tn, 128)
    logits_ref[...] = logits                                             # lane-dense store

    # cross entropy: logsumexp(logits) - logits[target]  (padded cols = -1e30)
    m = jnp.max(logits, axis=-1, keepdims=True)
    lse = m + jnp.log(jnp.sum(jnp.exp(logits - m), axis=-1, keepdims=True))
    onehot_tgt = (iota_v == tgt_ref[...]).astype(jnp.float32)
    tgt_logit = jnp.sum(onehot_tgt * logits, axis=-1, keepdims=True)
    per_tok = lse - tgt_logit                                            # (tn, 1)

    # mask out padded rows, accumulate sum on the scalar/SMEM path
    row = i * tile_n + jax.lax.broadcasted_iota(jnp.int32, (tile_n, 1), 0)
    valid = (row < n_valid).astype(jnp.float32)
    loss_acc[0] += jnp.sum(per_tok * valid)

    @pl.when(i == pl.num_programs(0) - 1)
    def _():
        loss_ref[...] = (loss_acc[0] / jnp.float32(n_valid)).reshape(1, 1)


def _bigram_logits_kernel(idx_ref, table_ref, logits_ref):
    """Inference path: logits only — no cross-entropy work, no target DMA."""
    tile_n = idx_ref.shape[0]
    v_pad = table_ref.shape[1]
    iota_v = jax.lax.broadcasted_iota(jnp.int32, (tile_n, v_pad), 1)
    onehot_idx = (iota_v == idx_ref[...]).astype(jnp.float32)
    logits_ref[...] = jnp.dot(onehot_idx, table_ref[...],
                              preferred_element_type=jnp.float32)


# ---------------------------------------------------------------------------
# Wrappers
# ---------------------------------------------------------------------------

@jax.jit
def _bigram_pallas_loss(idx, targets, table):
    B, T = idx.shape
    N = B * T
    v_pad = table.shape[1]
    tile_n, n_pad = _tiling(N)
    grid = (n_pad // tile_n,)

    idx2 = _pad_rows(idx.reshape(N, 1).astype(jnp.int32), n_pad)
    tgt2 = _pad_rows(targets.reshape(N, 1).astype(jnp.int32), n_pad)

    row_spec = pl.BlockSpec((tile_n, 1), lambda i: (i, 0))
    table_spec = pl.BlockSpec((v_pad, v_pad), lambda i: (0, 0))
    logits_spec = pl.BlockSpec((tile_n, v_pad), lambda i: (i, 0))

    logits_p, loss = pl.pallas_call(
        functools.partial(_bigram_loss_kernel, N),
        grid=grid,
        out_shape=(
            jax.ShapeDtypeStruct((n_pad, v_pad), jnp.float32),
            jax.ShapeDtypeStruct((1, 1), jnp.float32),
        ),
        in_specs=[row_spec, row_spec, table_spec],
        out_specs=(logits_spec, pl.BlockSpec((1, 1), lambda i: (0, 0))),
        scratch_shapes=[pltpu.SMEM((1,), jnp.float32)],
        compiler_params=pltpu.CompilerParams(
            dimension_semantics=("arbitrary",)),   # loss accumulator carries across tiles
    )(idx2, tgt2, table)

    # PyTorch returns logits already .view(B*T, C) on the loss path.
    logits = logits_p[:N, :vocab_size]
    return logits, loss[0, 0]


@jax.jit
def _bigram_pallas_logits(idx, table):
    B, T = idx.shape
    N = B * T
    v_pad = table.shape[1]
    tile_n, n_pad = _tiling(N)
    grid = (n_pad // tile_n,)

    idx2 = _pad_rows(idx.reshape(N, 1).astype(jnp.int32), n_pad)

    logits_p = pl.pallas_call(
        _bigram_logits_kernel,
        grid=grid,
        out_shape=jax.ShapeDtypeStruct((n_pad, v_pad), jnp.float32),
        in_specs=[pl.BlockSpec((tile_n, 1), lambda i: (i, 0)),
                  pl.BlockSpec((v_pad, v_pad), lambda i: (0, 0))],
        out_specs=pl.BlockSpec((tile_n, v_pad), lambda i: (i, 0)),
        compiler_params=pltpu.CompilerParams(
            dimension_semantics=("parallel",)),    # independent row tiles (megacore)
    )(idx2, table)

    return logits_p[:N, :vocab_size].reshape(B, T, vocab_size)


# ---------------------------------------------------------------------------
# Model
# ---------------------------------------------------------------------------

class BigramLanguageModelPallas:
    """JAX/Pallas port of the PyTorch BigramLanguageModel forward pass."""

    def __init__(self, key):
        k_emb, k_w, k_b = jax.random.split(key, 3)
        # nn.Embedding: N(0, 1)
        self.emb = jax.random.normal(k_emb, (vocab_size, n_embd), jnp.float32)
        # nn.Linear(n_embd, vocab_size): U(-1/sqrt(in), 1/sqrt(in)), weight (out, in)
        bound = 1.0 / jnp.sqrt(jnp.float32(n_embd))
        self.w = jax.random.uniform(k_w, (vocab_size, n_embd), jnp.float32,
                                    -bound, bound)
        self.b = jax.random.uniform(k_b, (vocab_size,), jnp.float32,
                                    -bound, bound)

        # Fused bigram table (exact for this model): logits(token) = table[token]
        table = self.emb @ self.w.T + self.b[None, :]                 # (V, V)
        padded = jnp.zeros((VOCAB_PAD, VOCAB_PAD), jnp.float32)
        padded = padded.at[:vocab_size, vocab_size:].set(NEG_BIG)     # dead logit cols
        padded = padded.at[:vocab_size, :vocab_size].set(table)       # real table
        self.table = padded                                           # (128, 128)
        # Note: token ids outside [0, vocab_size) select a zero padded row
        # (silent divergence from a PyTorch gather, which would error).

    def forward(self, idx, targets=None):
        if targets is None:
            return _bigram_pallas_logits(idx, self.table), None
        return _bigram_pallas_loss(idx, targets, self.table)

    # TODO(synk): generate() uses torch.multinomial sampling in a host-side loop; not ported.


def _reference(idx, targets, emb, w, b):
    tok_embd = emb[idx]                                  # (B, T, E)
    logits = tok_embd @ w.T + b                          # (B, T, V)
    B, T, V = logits.shape
    lf = logits.reshape(B * T, V)
    tf = targets.reshape(B * T)
    lse = jax.scipy.special.logsumexp(lf, axis=-1)
    loss = jnp.mean(lse - lf[jnp.arange(B * T), tf])
    return logits, loss


if __name__ == "__main__":
    key = jax.random.PRNGKey(0)
    k_model, k_idx, k_tgt = jax.random.split(key, 3)

    B, T = 2, 8
    idx = jax.random.randint(k_idx, (B, T), 0, vocab_size, dtype=jnp.int32)
    targets = jax.random.randint(k_tgt, (B, T), 0, vocab_size, dtype=jnp.int32)

    model = BigramLanguageModelPallas(k_model)

    # training path (logits + loss); PyTorch returns (B*T, V) logits here
    logits, loss = model.forward(idx, targets)
    jax.block_until_ready((logits, loss))

    # inference path (logits only, separate kernel); PyTorch returns (B, T, V)
    logits_inf, loss_none = model.forward(idx, None)
    jax.block_until_ready(logits_inf)

    ref_logits, ref_loss = _reference(idx, targets, model.emb, model.w, model.b)
    assert logits.shape == (B * T, vocab_size)
    assert logits_inf.shape == (B, T, vocab_size)
    assert loss_none is None
    assert jnp.allclose(logits, ref_logits.reshape(B * T, vocab_size),
                        atol=1e-4, rtol=1e-4)
    assert jnp.allclose(logits_inf, ref_logits, atol=1e-4, rtol=1e-4)
    assert jnp.allclose(loss, ref_loss, atol=1e-4, rtol=1e-4)

    print("KERNEL_OK")
</pallas_src>

<mosaic_0001>
module attributes {stable_mosaic.version = 11 : i64} {
  func.func @_bigram_loss_kernel(%arg0: i32, %arg1: memref<16x1xi32, #tpu.memory_space<vmem>>, %arg2: memref<16x1xi32, #tpu.memory_space<vmem>>, %arg3: memref<128x128xf32, #tpu.memory_space<vmem>>, %arg4: memref<16x128xf32, #tpu.memory_space<vmem>>, %arg5: memref<1x1xf32, #tpu.memory_space<vmem>>, %arg6: memref<1xf32, #tpu.memory_space<smem>>) attributes {dimension_semantics = [#tpu.dimension_semantics<arbitrary>], iteration_bounds = array<i64: 1>, scalar_prefetch = 0 : i64, scratch_operands = 1 : i64, tpu.core_type = #tpu.core_type<tc>, window_params = [{transform_indices = @transform_0, window_bounds = array<i64: 16, 1>}, {transform_indices = @transform_1, window_bounds = array<i64: 16, 1>}, {pipeline_mode = #tpu.pipeline_mode<synchronous>, transform_indices = @transform_2, window_bounds = array<i64: 128, 128>}, {transform_indices = @transform_3, window_bounds = array<i64: 16, 128>}, {pipeline_mode = #tpu.pipeline_mode<synchronous>, transform_indices = @transform_4, window_bounds = array<i64: 1, 1>}]} {
    %c0_i32 = arith.constant 0 : i32
    %0 = arith.cmpi eq, %arg0, %c0_i32 : i32
    %1 = arith.extui %0 : i1 to i32
    %c0_i32_0 = arith.constant 0 : i32
    %2 = arith.cmpi ne, %1, %c0_i32_0 : i32
    scf.if %2 {
      %cst_17 = arith.constant 0.000000e+00 : f32
      %c0_18 = arith.constant 0 : index
      %49 = memref.load %arg6[%c0_18] : memref<1xf32, #tpu.memory_space<smem>>
      memref.store %cst_17, %arg6[%c0_18] : memref<1xf32, #tpu.memory_space<smem>>
    } else {
    }
    %3 = tpu.iota {dimensions = array<i32: 1>} : vector<16x128xi32>
    %c0 = arith.constant 0 : index
    %c0_1 = arith.constant 0 : index
    %4 = vector.load %arg1[%c0, %c0_1] : memref<16x1xi32, #tpu.memory_space<vmem>>, vector<16x1xi32>
    %5 = vector.broadcast %4 : vector<16x1xi32> to vector<16x128xi32>
    %6 = arith.cmpi eq, %3, %5 : vector<16x128xi32>
    %7 = arith.extui %6 : vector<16x128xi1> to vector<16x128xi32>
    %8 = arith.sitofp %7 : vector<16x128xi32> to vector<16x128xf32>
    %c0_2 = arith.constant 0 : index
    %c0_3 = arith.constant 0 : index
    %9 = vector.load %arg3[%c0_2, %c0_3] : memref<128x128xf32, #tpu.memory_space<vmem>>, vector<128x128xf32>
    %cst = arith.constant dense<0.000000e+00> : vector<16x128xf32>
    %10 = tpu.matmul %8, %9, %cst {dimension_numbers = #tpu.dot_dimension_numbers<[1], [0], [0], [1], [0, 0, 1, 1], [], []>} : vector<16x128xf32>, vector<128x128xf32>, vector<16x128xf32> -> vector<16x128xf32>
    %c0_4 = arith.constant 0 : index
    %c0_5 = arith.constant 0 : index
    %11 = vector.load %arg4[%c0_4, %c0_5] : memref<16x128xf32, #tpu.memory_space<vmem>>, vector<16x128xf32>
    tpu.vector_store %arg4[%c0_4, %c0_5], %10 {strides = array<i32>} : memref<16x128xf32, #tpu.memory_space<vmem>>, vector<16x128xf32>,
    %cst_6 = arith.constant dense<0xFF800000> : vector<16xf32>
    %12 = vector.multi_reduction <maximumf>, %10, %cst_6 [1] : vector<16x128xf32> to vector<16xf32>
    %13 = vector.shape_cast %12 : vector<16xf32> to vector<16x1xf32>
    %14 = vector.broadcast %13 : vector<16x1xf32> to vector<16x128xf32>
    %15 = arith.subf %10, %14 : vector<16x128xf32>
    %16 = math.exp %15 : vector<16x128xf32>
    %cst_7 = arith.constant dense<0.000000e+00> : vector<16xf32>
    %17 = vector.multi_reduction <add>, %16, %cst_7 [1] : vector<16x128xf32> to vector<16xf32>
    %18 = vector.shape_cast %17 : vector<16xf32> to vector<16x1xf32>
    %19 = math.log %18 : vector<16x1xf32>
    %20 = arith.addf %13, %19 : vector<16x1xf32>
    %c0_8 = arith.constant 0 : index
    %c0_9 = arith.constant 0 : index
    %21 = vector.load %arg2[%c0_8, %c0_9] : memref<16x1xi32, #tpu.memory_space<vmem>>, vector<16x1xi32>
    %22 = vector.broadcast %21 : vector<16x1xi32> to vector<16x128xi32>
    %23 = arith.cmpi eq, %3, %22 : vector<16x128xi32>
    %24 = arith.extui %23 : vector<16x128xi1> to vector<16x128xi32>
    %25 = arith.sitofp %24 : vector<16x128xi32> to vector<16x128xf32>
    %26 = arith.mulf %25, %10 : vector<16x128xf32>
    %cst_10 = arith.constant dense<0.000000e+00> : vector<16xf32>
    %27 = vector.multi_reduction <add>, %26, %cst_10 [1] : vector<16x128xf32> to vector<16xf32>
    %28 = vector.shape_cast %27 : vector<16xf32> to vector<16x1xf32>
    %29 = arith.subf %20, %28 : vector<16x1xf32>
    %c16_i32 = arith.constant 16 : i32
    %30 = arith.muli %arg0, %c16_i32 : i32
    %31 = tpu.iota {dimensions = array<i32: 0>} : vector<16x1xi32>
    %32 = vector.broadcast %30 : i32 to vector<16x1xi32>
    %33 = arith.addi %32, %31 : vector<16x1xi32>
    %c16_i32_11 = arith.constant 16 : i32
    %34 = vector.broadcast %c16_i32_11 : i32 to vector<16x1xi32>
    %35 = arith.cmpi slt, %33, %34 : vector<16x1xi32>
    %36 = arith.extui %35 : vector<16x1xi1> to vector<16x1xi32>
    %37 = arith.sitofp %36 : vector<16x1xi32> to vector<16x1xf32>
    %c0_12 = arith.constant 0 : index
    %38 = memref.load %arg6[%c0_12] : memref<1xf32, #tpu.memory_space<smem>>
    %39 = arith.mulf %29, %37 : vector<16x1xf32>
    %40 = vector.shape_cast %39 : vector<16x1xf32> to vector<1x16x1xf32>
    %cst_13 = arith.constant dense<0.000000e+00> : vector<1xf32>
    %41 = vector.multi_reduction <add>, %40, %cst_13 [1, 2] : vector<1x16x1xf32> to vector<1xf32>
    %42 = vector.shape_cast %41 : vector<1xf32> to vector<1x1x1xf32>
    %43 = vector.extract %42[0, 0, 0] : f32 from vector<1x1x1xf32>
    %44 = arith.addf %38, %43 : f32
    %c0_14 = arith.constant 0 : index
    %45 = memref.load %arg6[%c0_14] : memref<1xf32, #tpu.memory_space<smem>>
    memref.store %44, %arg6[%c0_14] : memref<1xf32, #tpu.memory_space<smem>>
    %c0_i32_15 = arith.constant 0 : i32
    %46 = arith.cmpi eq, %arg0, %c0_i32_15 : i32
    %47 = arith.extui %46 : i1 to i32
    %c0_i32_16 = arith.constant 0 : i32
    %48 = arith.cmpi ne, %47, %c0_i32_16 : i32
    scf.if %48 {
      %c0_17 = arith.constant 0 : index
      %49 = memref.load %arg6[%c0_17] : memref<1xf32, #tpu.memory_space<smem>>
      %cst_18 = arith.constant 1.600000e+01 : f32
      %50 = arith.divf %49, %cst_18 : f32
      %51 = vector.broadcast %50 : f32 to vector<1x1xf32>
      %c0_19 = arith.constant 0 : index
      %c0_20 = arith.constant 0 : index
      %52 = vector.load %arg5[%c0_19, %c0_20] : memref<1x1xf32, #tpu.memory_space<vmem>>, vector<1x1xf32>
      tpu.vector_store %arg5[%c0_19, %c0_20], %51 {strides = array<i32>} : memref<1x1xf32, #tpu.memory_space<vmem>>, vector<1x1xf32>,
    } else {
    }
    return
  }
  func.func @transform_0(%arg0: i32) -> (i32, i32) {
    %c0_i32 = arith.constant 0 : i32
    %c0_i32_0 = arith.constant 0 : i32
    return %arg0, %c0_i32 : i32, i32
  }
  func.func @transform_1(%arg0: i32) -> (i32, i32) {
    %c0_i32 = arith.constant 0 : i32
    %c0_i32_0 = arith.constant 0 : i32
    return %arg0, %c0_i32 : i32, i32
  }
  func.func @transform_2(%arg0: i32) -> (i32, i32) {
    %c0_i32 = arith.constant 0 : i32
    %c0_i32_0 = arith.constant 0 : i32
    %c0_i32_1 = arith.constant 0 : i32
    return %c0_i32, %c0_i32_0 : i32, i32
  }
  func.func @transform_3(%arg0: i32) -> (i32, i32) {
    %c0_i32 = arith.constant 0 : i32
    %c0_i32_0 = arith.constant 0 : i32
    return %arg0, %c0_i32 : i32, i32
  }
  func.func @transform_4(%arg0: i32) -> (i32, i32) {
    %c0_i32 = arith.constant 0 : i32
    %c0_i32_0 = arith.constant 0 : i32
    %c0_i32_1 = arith.constant 0 : i32
    return %c0_i32, %c0_i32_0 : i32, i32
  }
}

</mosaic_0001>

<bundles_post_ra>
// kernel: _bigram_pallas_loss.1
= control target key start
LH: loop header
LB: loop body
LE: loop exit
PB: predicated region body
PF: predicated region fallthrough
CT: control target
= control target key end

     0   :  { %10 = vsyncpa [#allocation4], 0  ;;  %s408_s0 = inlined_call_operand.vmem [shape: s32[16,1], index: 0, kind: input, shape index: {}]   ;;  %s409_s1 = inlined_call_operand.vmem [shape: s32[16,1], index: 1, kind: input, shape index: {}]   ;;  %s410_s2 = inlined_call_operand.hbm [shape: f32[128,128], index: 2, kind: input, shape index: {}]   ;;  %s411_s3 = inlined_call_operand.hbm [shape: f32[16,128], index: 3, kind: output, shape index: {0}]   ;;  %s412_s4 = inlined_call_operand.hbm [shape: f32[1,1], index: 4, kind: output, shape index: {1}]  }
   0x1   :  { %11 = vsyncpa [#allocation5], 0 }
   0x2   :  { %12 = vsyncpa [#allocation8], 0  ;;  %s21_s17 = sshll.u32 %s410_s2, 4  ;;  %s347_s18 = smov [#allocation3]   ;;  %s22_s17 = int_to_ptr.hbm [resolvable:$true] %s21_s17 }
   0x3   :  { %s23_s19 = sshll.u32 %s347_s18, 4  ;;  %s348_s20 = smov 128   ;;  %s24_s19 = int_to_ptr.vmem [resolvable:$true] %s23_s19 }
   0x4   :  { %s349_s21 = smov 8  }
   0x5   :  { %29 = dma.hbm_to_vmem [thread:$0]  %s22_s17, 2048, %s24_s19, [#allocation4], %s348_s20, %s348_s20, %s349_s21  }
   0x6   :  { %341 = dma.done.wait [#allocation4], 2048  }
   0x7   :  { %342 = vsyncadd [#allocation4], 4294965248  ;;  %v350_v0 = vmov 0   ;;  %v42_v1 = vld [vmem:[%s408_s0] sm:$0xff]  ;;  %v71_v2 = vld [vmem:[#allocation3 + $0x78] sm:$0xff]  ;;  %v40_v21 = vlaneseq  ;;  %v351_v24 = vmov 1.0  }
   0x8   :  { %257 = vset.pattern.permute.xlu0 %v350_v0  ;;  %258 = vset.pattern.permute.xlu2 %v350_v0  ;;  %v70_v3 = vld [vmem:[#allocation3 + $0x70] sm:$0xff]  ;;  %v69_v4 = vld [vmem:[#allocation3 + $0x68] sm:$0xff]  ;;  %v68_v5 = vld [vmem:[#allocation3 + $0x60] sm:$0xff]  ;;  %v352_v27 = vmov 0.0   ;;  %vm155_vm4 = vcmask 7168   ;;  %s193_s5 = sshll.u32 %s411_s3, 4  ;;  %s194_s5 = int_to_ptr.hbm [resolvable:$true] %s193_s5 }
   0x9   :  { %45 = vperm.xlu0 %257, %v42_v1   ;;  %72 = vmatpush.msra.mxu0 %v71_v2  ;;  %v43_v6 = vld [vmem:[%s408_s0 + $0x8] sm:$0xff]  ;;  %v67_v7 = vld [vmem:[#allocation3 + $0x58] sm:$0xff]  ;;  %v66_v8 = vld [vmem:[#allocation3 + $0x50] sm:$0xff]  ;;  %v41_v22 = vand.u32 127, %v40_v21  ;;  %v354_v58 = vmov 16.0   ;;  %s355_s3 = smov [#allocation7]  }
   0xa   :  { %228 = vmatpush.msra.mxu1 %v71_v2  ;;  %v65_v9 = vld [vmem:[#allocation3 + $0x48] sm:$0xff]  ;;  %v64_v10 = vld [vmem:[#allocation3 + $0x40] sm:$0xff]  ;;  %v63_v11 = vld [vmem:[#allocation3 + $0x38] sm:$0xff]  ;;  %s205_s6 = sshll.u32 %s355_s3, 4  ;;  %s207_s10 = sshll.u32 %s412_s4, 4  ;;  %vm185_vm6 = vcmask 0   ;;  %s206_s6 = int_to_ptr.vmem [resolvable:$true] %s205_s6  ;;  %s208_s10 = int_to_ptr.hbm [resolvable:$true] %s207_s10 }
   0xb   :  { %73 = vmatpush.msra.mxu0 %v70_v3  ;;  %v62_v12 = vld [vmem:[#allocation3 + $0x30] sm:$0xff]  ;;  %v61_v13 = vld [vmem:[#allocation3 + $0x28] sm:$0xff]  ;;  %v60_v14 = vld [vmem:[#allocation3 + $0x20] sm:$0xff] }
   0xc   :  { %229 = vmatpush.msra.mxu1 %v70_v3  ;;  %v59_v15 = vld [vmem:[#allocation3 + $0x18] sm:$0xff]  ;;  %v58_v16 = vld [vmem:[#allocation3 + $0x10] sm:$0xff]  ;;  %v57_v17 = vld [vmem:[#allocation3 + $0x8] sm:$0xff] }
   0xd   :  { %74 = vmatpush.msra.mxu0 %v69_v4  ;;  %v56_v18 = vld [vmem:[#allocation3] sm:$0xff]  ;;  %v118_v20 = vld [vmem:[%s409_s1 + $0x8] sm:$0xff] }
   0xe   :  { %230 = vmatpush.msra.mxu1 %v69_v4  ;;  %v117_v19 = vld [vmem:[%s409_s1] sm:$0xff]  ;;  %s353_s1 = smov [#allocation6]  }
   0xf   :  { %75 = vmatpush.msra.mxu0 %v68_v5  ;;  %120 = vperm.xlu2 %258, %v117_v19   ;;  %s191_s28 = sshll.u32 %s353_s1, 4  ;;  %s192_s28 = int_to_ptr.vmem [resolvable:$true] %s191_s28 }
  0x10   :  { %231 = vmatpush.msra.mxu1 %v68_v5 }
  0x11   :  { %48 = vperm.xlu0 %257, %v43_v6   ;;  %76 = vmatpush.msra.mxu0 %v67_v7 }
  0x12   :  { %232 = vmatpush.msra.mxu1 %v67_v7 }
  0x13   :  { %77 = vmatpush.msra.mxu0 %v66_v8 }
  0x14   :  { %233 = vmatpush.msra.mxu1 %v66_v8 }
  0x15   :  { %78 = vmatpush.msra.mxu0 %v65_v9 }
  0x16   :  { %234 = vmatpush.msra.mxu1 %v65_v9 }
  0x17   :  { %79 = vmatpush.msra.mxu0 %v64_v10  ;;  %123 = vperm.xlu2 %258, %v118_v20  }
  0x18   :  { %235 = vmatpush.msra.mxu1 %v64_v10 }
  0x19   :  { %80 = vmatpush.msra.mxu0 %v63_v11 }
  0x1a   :  { %236 = vmatpush.msra.mxu1 %v63_v11 }
  0x1b   :  { %81 = vmatpush.msra.mxu0 %v62_v12 }
  0x1c   :  { %237 = vmatpush.msra.mxu1 %v62_v12 }
  0x1d   :  { %82 = vmatpush.msra.mxu0 %v61_v13 }
  0x1e   :  { %238 = vmatpush.msra.mxu1 %v61_v13 }
  0x1f   :  { %83 = vmatpush.msra.mxu0 %v60_v14 }
  0x20   :  { %239 = vmatpush.msra.mxu1 %v60_v14 }
  0x21   :  { %84 = vmatpush.msra.mxu0 %v59_v15 }
  0x22   :  { %240 = vmatpush.msra.mxu1 %v59_v15 }
  0x23   :  { %85 = vmatpush.msra.mxu0 %v58_v16 }
  0x24   :  { %241 = vmatpush.msra.mxu1 %v58_v16 }
  0x25   :  { %86 = vmatpush.msra.mxu0 %v57_v17 }
  0x26   :  { %242 = vmatpush.msra.mxu1 %v57_v17 }
  0x27   :  { %87 = vmatpush.msra.mxu0 %v56_v18 }
  0x28   :  { %243 = vmatpush.msra.mxu1 %v56_v18 }
  0x69   :  { %v121_v26 = vpop.permute.xlu2 %120 }
  0x6a   :  { %vm125_vm2 = vcmp.eq.s32.totalorder %v41_v22, %v121_v26 }
  0x6b   :  { %v226_v28 = vsel %vm125_vm2, 1.0, %v352_v27 }
  0x71   :  { %v124_v39 = vpop.permute.xlu2 %123 }
  0x72   :  { %vm126_vm3 = vcmp.eq.s32.totalorder %v41_v22, %v124_v39 }
  0x73   :  { %v227_v41 = vsel %vm126_vm3, 1.0, %v352_v27 }
  0x7b   :  { %v46_v23 = vpop.permute.xlu0 %45 }
  0x7c   :  { %vm50_vm0 = vcmp.eq.s32.totalorder %v41_v22, %v46_v23 }
  0x7d   :  { %224 = vmatmul.msk.f32.vlgmr.msra.gmra.mxu0 %vm50_vm0, %v351_v24 }
  0x83   :  { %v49_v25 = vpop.permute.xlu0 %48 }
  0x84   :  { %vm51_vm1 = vcmp.eq.s32.totalorder %v41_v22, %v49_v25 }
  0x85   :  { %225 = vmatmul.msk.f32.vlgmr.msra.gmra.mxu1 %vm51_vm1, %v351_v24 }
  0xfa   :  { %v89_v29 = vpop.f32.mrf.mxu0 }
  0xfb   :  { %95 = vst [vmem:[#allocation6] sm:$0xff] %v89_v29  ;;  %97 = vmax.xlane.f32.xlu1 %v89_v29  ;;  %v131_v30 = vmul.f32 %v226_v28, %v89_v29 }
  0xfd   :  { %133 = vadd.xlane.f32.xlu2 %v131_v30 }
 0x102   :  { %v92_v31 = vpop.f32.mrf.mxu1 }
 0x103   :  { %96 = vst [vmem:[#allocation6 + $0x8] sm:$0xff] %v92_v31  ;;  %99 = vmax.xlane.f32.xlu1 %v92_v31  ;;  %v132_v42 = vmul.f32 %v227_v41, %v92_v31 }
 0x104   :  { %199 = dma.vmem_to_hbm [thread:$0]  %s192_s28, 256, %s194_s5, [#allocation5], %s348_s20, %s348_s20, %s349_s21  }
 0x16e   :  { %v98_v32 = vpop.xlane.xlu1 %97 }
 0x16f   :  { %v101_v33 = vsub.f32 %v89_v29, %v98_v32 }
 0x170   :  { %v134_v50 = vpop.xlane.xlu2 %133 }
 0x171   :  { %v103_v34 = vmul.f32 1.442695, %v101_v33 }
 0x173   :  { %259 = vpow2.f32 %v103_v34 }
 0x176   :  { %v100_v35 = vpop.xlane.xlu1 %99 }
 0x177   :  { %v102_v36 = vsub.f32 %v92_v31, %v100_v35 }
 0x179   :  { %v260_v37 = vpop.eup %259  ;;  %v105_v38 = vmul.f32 1.442695, %v102_v36 }
 0x17a   :  { %107 = vadd.xlane.f32.xlu0 %v260_v37 }
 0x17b   :  { %261 = vpow2.f32 %v105_v38 }
 0x181   :  { %v262_v40 = vpop.eup %261 }
 0x182   :  { %109 = vadd.xlane.f32.xlu1 %v262_v40 }
 0x18a   :  { %135 = vadd.xlane.f32.xlu1 %v132_v42 }
 0x1ed   :  { %v108_v43 = vpop.xlane.xlu0 %107 }
 0x1ee   :  { %263 = vlog2.f32 %v108_v43 }
 0x1f4   :  { %v264_v44 = vpop.eup %263 }
 0x1f5   :  { %v110_v45 = vpop.xlane.xlu1 %109  ;;  %v112_v46 = vmul.f32 0.6931472, %v264_v44 }
 0x1f6   :  { %265 = vlog2.f32 %v110_v45 }
 0x1f7   :  { %v115_v47 = vadd.f32 %v112_v46, %v98_v32  ;;  %267 = vrcp.f32 %v354_v58 }
 0x1f9   :  { %v137_v52 = vsub.f32 %v115_v47, %v134_v50 }
 0x1fb   :  { %v156_v55 = vsel %vm155_vm4, %v137_v52, 0.0 }
 0x1fc   :  { %v266_v48 = vpop.eup %265 }
 0x1fd   :  { %v114_v49 = vmul.f32 0.6931472, %v266_v48  ;;  %v136_v53 = vpop.xlane.xlu1 %135  ;;  %v268_v59 = vpop.eup %267 }
 0x1fe   :  { %v176_v60 = vmul.f32 16.0, %v268_v59  ;;  %vm180_vm5 = vweird.f32 %v268_v59 }
 0x1ff   :  { %v116_v51 = vadd.f32 %v114_v49, %v100_v35 }
 0x200   :  { %v177_v61 = vsub.f32 1.0, %v176_v60 }
 0x201   :  { %v138_v54 = vsub.f32 %v116_v51, %v136_v53 }
 0x202   :  { %v178_v1 = vmul.f32 %v268_v59, %v177_v61 }
 0x203   :  { %v157_v56 = vsel %vm155_vm4, %v138_v54, 0.0 }
 0x204   :  { %v158_v57 = vadd.f32 %v157_v56, %v156_v55  ;;  %v179_v4 = vadd.f32 %v268_v59, %v178_v1 }
 0x206   :  { %159 = vadd.xlane.f32.xlu1 %v158_v57  ;;  %v181_v7 = vsel %vm180_vm5, %v268_v59, %v179_v4 }
 0x279   :  { %v160_v62 = vpop.xlane.xlu1 %159 }
 0x27a   :  { %v161_v63 = vrot.slane %v160_v62, 4 }
 0x27c   :  { %v162_v0 = vadd.f32 %v161_v63, %v160_v62 }
 0x27e   :  { %v163_v2 = vrot.slane %v162_v0, 2 }
 0x280   :  { %v164_v3 = vadd.f32 %v163_v2, %v162_v0 }
 0x282   :  { %v165_v5 = vrot.slane %v164_v3, 1 }
 0x284   :  { %v166_v6 = vadd.f32 %v165_v5, %v164_v3 }
 0x286   :  { %244 = vpush %v166_v6 }
 0x287   :  { %246 = vpush %v181_v7 }
 0x2b7   :  { %s245_s7 = spop %244 }
 0x2b8   :  { %s247_s11 = spop %246 }
 0x2b9   :  { %s183_s12 = smul.f32 %s247_s11, %s245_s7 }
 0x2bb   :  { %v184_v8 = vstv %s183_s12 }
 0x2bc   :  { %186 = vst.msk [vmem:[#allocation7] sm:$0x1] %vm185_vm6, %v184_v8 }
 0x2bd   :  { %210 = dma.vmem_to_hbm [thread:$0]  %s206_s6, 16, %s208_s10, [#allocation8]  }
 0x2be   :  { %343 = dma.done.wait [#allocation5], 256  }
 0x2bf   :  { %344 = vsyncadd [#allocation5], 4294967040 }
 0x2c0   :  { %345 = dma.done.wait [#allocation8], 16  }
 0x2c1   :  { %346 = vsyncadd [#allocation8], 4294967280 }
 0x2c2   :  { %219 = vsyncpa [#allocation4], 1 }
 0x2c3   :  { %220 = vsyncpa [#allocation5], 1 }
 0x2c4   :  { %221 = vsyncpa [#allocation8], 1 }

</bundles_post_ra>
